<compile_context>
chip_gen: v6e
topology: v6e:2x2x1
jax: 0.10.0
libtpu: 0.0.40
codegen_flags: <defaults>
</compile_context>

<pallas_src>
import functools

import jax
import jax.numpy as jnp
from jax.experimental import pallas as pl
from jax.experimental.pallas import tpu as pltpu


def _spatial_attention_kernel(x_ref, w1t_ref, b1_ref, w2t_ref, b2_ref,
                              wd_ref, gb_ref, mask_ref, o_ref, *,
                              inv_len, apply_edge_mask):
    """One batch tile: (Bt, C, L) -> (Bt, C, L).  All compute in float32."""
    x = x_ref[...].astype(jnp.float32)                    # (Bt, C, L)
    Bt, C, L = x.shape

    # ---- squeeze: adaptive_avg_pool1d over the *unpadded* length (padded lanes
    #      of x are zero, so the sum is exact).
    ctx = jnp.sum(x, axis=2) * inv_len                     # (Bt, C)

    # ---- excite: two 1x1 convs as batch-fused MXU matmuls.
    h = jnp.dot(ctx, w1t_ref[...],
                preferred_element_type=jnp.float32) + b1_ref[...]
    h = jnp.maximum(h, 0.0)                                # (Bt, Cr)
    gate = (jnp.dot(h, w2t_ref[...],
                    preferred_element_type=jnp.float32)
            + b2_ref[...] + gb_ref[...])                   # (Bt, C); dw-bias folded in

    # ---- depthwise conv1d: kernel=3, padding=1, groups=C  (XLU rolls, idle slot).
    #      Accumulate `spatial` in place so only one rolled copy is live at a time.
    wd = wd_ref[...]                                       # (C, 3)
    x2 = x.reshape(Bt * C, L)

    spatial = wd[None, :, 1:2] * x                         # center tap

    x_lm1 = pltpu.roll(x2, shift=1, axis=1)                # left neighbor x[l-1]
    if apply_edge_mask:
        x_lm1 = x_lm1 * mask_ref[0:1, :]                   # zero wrapped-in lane 0
    spatial = spatial + wd[None, :, 0:1] * x_lm1.reshape(Bt, C, L)

    x_lp1 = pltpu.roll(x2, shift=L - 1, axis=1)            # right neighbor x[l+1]
    if apply_edge_mask:
        x_lp1 = x_lp1 * mask_ref[1:2, :]                   # zero lane orig_L-1
    spatial = spatial + wd[None, :, 2:3] * x_lp1.reshape(Bt, C, L)

    # ---- sigmoid gate via tanh (single EUP op, no f32 divide) and output.
    z = gate.reshape(Bt, C, 1) + spatial
    attn = 0.5 * (jnp.tanh(0.5 * z) + 1.0)
    o_ref[...] = (x * attn).astype(o_ref.dtype)


def spatial_attention(x, w1, b1, w2, b2, wd, bd, *,
                      block_batches=None,
                      target_block_bytes=4 << 20,
                      vmem_limit_bytes=48 << 20):
    """x: (B, C, L) f32 or bf16; w1: (Cr, C); b1: (Cr, 1); w2: (C, Cr);
    b2: (C, 1); wd: (C, 3); bd: (C, 1) — PyTorch Conv1d params (k=1 squeezed)."""
    B, C, L = x.shape
    Cr = w1.shape[0]
    orig_B, orig_C, orig_L = B, C, L
    io_dtype = x.dtype

    # Params are tiny — keep them f32 regardless of the I/O dtype.
    w1 = w1.astype(jnp.float32); b1 = b1.astype(jnp.float32)
    w2 = w2.astype(jnp.float32); b2 = b2.astype(jnp.float32)
    wd = wd.astype(jnp.float32); bd = bd.astype(jnp.float32)

    # Pad C/L so blocks satisfy the tiling constraint and stores stay unmasked.
    # bf16 packs 16 rows per sublane group, f32 packs 8.
    c_mult = 16 if io_dtype == jnp.bfloat16 else 8
    Cp = -(-C // c_mult) * c_mult
    Lp = -(-L // 128) * 128
    if (Cp, Lp) != (C, L):
        x = jnp.pad(x, ((0, 0), (0, Cp - C), (0, Lp - L)))
        w1 = jnp.pad(w1, ((0, 0), (0, Cp - C)))
        w2 = jnp.pad(w2, ((0, Cp - C), (0, 0)))
        b2 = jnp.pad(b2, ((0, Cp - C), (0, 0)))
        wd = jnp.pad(wd, ((0, Cp - C), (0, 0)))
        bd = jnp.pad(bd, ((0, Cp - C), (0, 0)))

    # Edge masks for the k=3 conv are only needed when L was NOT padded: with
    # padding, the lanes the rolls wrap in are already zero and padded-lane
    # outputs are sliced off below.
    apply_edge_mask = (Lp == orig_L)
    lane = jnp.arange(Lp)
    mask = jnp.stack([lane != 0, lane != (orig_L - 1)], axis=0).astype(jnp.float32)

    # Pre-transpose 1x1-conv params so the kernel computes (Bt,C)@(C,Cr)@(Cr,C).
    w1t = w1.T                          # (Cp, Cr)
    w2t = w2.T                          # (Cr, Cp)
    b1r = b1.reshape(1, Cr)
    b2r = b2.reshape(1, Cp)
    gbr = bd.reshape(1, Cp)             # depthwise bias, folded into the gate

    # Batch-fused block size, budgeted against the f32 *compute* footprint so the
    # in-kernel temporaries (x_f32, spatial, z/attn) stay well inside the VMEM
    # limit on every generation.  B is padded up instead of collapsing to bt=1.
    if block_batches is None:
        bt = max(1, min(B, target_block_bytes // (Cp * Lp * 4)))
    else:
        bt = max(1, min(B, block_batches))
    Bp = -(-B // bt) * bt
    if Bp != B:
        x = jnp.pad(x, ((0, Bp - B), (0, 0), (0, 0)))
    grid = (Bp // bt,)

    kernel = functools.partial(_spatial_attention_kernel,
                               inv_len=1.0 / orig_L,
                               apply_edge_mask=apply_edge_mask)

    itemsize = jnp.dtype(io_dtype).itemsize
    flops = int(4 * Bp * Cp * Cr + 9 * Bp * Cp * Lp)
    bytes_accessed = int(2 * Bp * Cp * Lp * itemsize
                         + 4 * (w1t.size + w2t.size + b1r.size + b2r.size
                                + wd.size + gbr.size + mask.size))
    cost = pl.CostEstimate(flops=flops, transcendentals=int(Bp * Cp * Lp),
                           bytes_accessed=bytes_accessed)

    def full_spec(shape):
        return pl.BlockSpec(shape, lambda i: (0,) * len(shape))

    out = pl.pallas_call(
        kernel,
        out_shape=jax.ShapeDtypeStruct((Bp, Cp, Lp), io_dtype),
        grid_spec=pltpu.PrefetchScalarGridSpec(
            num_scalar_prefetch=0,
            grid=grid,
            in_specs=[
                pl.BlockSpec((bt, Cp, Lp), lambda i: (i, 0, 0)),  # x batch slab
                # TODO(synk): if profiling shows exposed DMA at step boundaries
                # after the VPU trims, add pipeline_mode=pl.Buffered(3) here.
                full_spec((Cp, Cr)), full_spec((1, Cr)),          # conv1 w^T, b
                full_spec((Cr, Cp)), full_spec((1, Cp)),          # conv2 w^T, b
                full_spec((Cp, 3)), full_spec((1, Cp)),           # dw taps, dw bias
                full_spec((2, Lp)),                               # edge masks
            ],
            out_specs=pl.BlockSpec((bt, Cp, Lp), lambda i: (i, 0, 0)),
        ),
        # TODO(synk): on v7x, switch the batch axis to pltpu.CORE_PARALLEL (or an
        # explicit leading grid axis of size 2) so both TensorCores are engaged.
        compiler_params=pltpu.CompilerParams(
            dimension_semantics=("parallel",),
            vmem_limit_bytes=vmem_limit_bytes),
        cost_estimate=cost,
    )(x, w1t, b1r, w2t, b2r, wd, gbr, mask)

    if (Bp, Cp, Lp) != (orig_B, orig_C, orig_L):
        out = out[:orig_B, :orig_C, :orig_L]
    return out


def reference(x, w1, b1, w2, b2, wd, bd):
    """Pure-JAX reference replicating the PyTorch forward pass (f32)."""
    ctx = jnp.mean(x, axis=2, keepdims=True)                             # (B,C,1)
    h = jnp.maximum(jnp.einsum('oc,bcl->bol', w1, ctx) + b1[None], 0.0)  # (B,Cr,1)
    ctx2 = jnp.einsum('oc,bcl->bol', w2, h) + b2[None]                   # (B,C,1)
    xp = jnp.pad(x, ((0, 0), (0, 0), (1, 1)))
    spatial = (wd[None, :, 0:1] * xp[:, :, :-2]
               + wd[None, :, 1:2] * xp[:, :, 1:-1]
               + wd[None, :, 2:3] * xp[:, :, 2:]
               + bd[None])                                               # (B,C,L)
    attn = jax.nn.sigmoid(ctx2 + spatial)
    return x * attn


if __name__ == "__main__":
    B, C, L = 2, 32, 128            # batch=2, channels=32, seq len=128
    R = 8                           # reduction_ratio
    Cr = C // R

    key = jax.random.PRNGKey(0)
    ks = jax.random.split(key, 7)
    x = jax.random.normal(ks[0], (B, C, L), jnp.float32)
    # PyTorch Conv1d weights with kernel-size-1 squeezed.
    w1 = jax.random.normal(ks[1], (Cr, C), jnp.float32) * 0.1   # conv1.weight (Cr,C,1)->(Cr,C)
    b1 = jax.random.normal(ks[2], (Cr, 1), jnp.float32) * 0.1   # conv1.bias
    w2 = jax.random.normal(ks[3], (C, Cr), jnp.float32) * 0.1   # conv2.weight (C,Cr,1)->(C,Cr)
    b2 = jax.random.normal(ks[4], (C, 1), jnp.float32) * 0.1    # conv2.bias
    wd = jax.random.normal(ks[5], (C, 3), jnp.float32) * 0.1    # spatial_conv.weight (C,1,3)->(C,3)
    bd = jax.random.normal(ks[6], (C, 1), jnp.float32) * 0.1    # spatial_conv.bias

    # float32 I/O path (matches PyTorch numerics).
    out_f32 = jax.block_until_ready(spatial_attention(x, w1, b1, w2, b2, wd, bd))
    ref_f32 = reference(x, w1, b1, w2, b2, wd, bd)
    assert out_f32.shape == (B, C, L)
    assert jnp.allclose(out_f32, ref_f32, atol=1e-4, rtol=1e-4), "f32 mismatch"

    # bfloat16 I/O path (halves HBM traffic; in-kernel compute stays f32).
    x_bf16 = x.astype(jnp.bfloat16)
    out_bf16 = jax.block_until_ready(
        spatial_attention(x_bf16, w1, b1, w2, b2, wd, bd))
    ref_bf16 = reference(x_bf16.astype(jnp.float32), w1, b1, w2, b2, wd, bd)
    assert out_bf16.shape == (B, C, L) and out_bf16.dtype == jnp.bfloat16
    assert jnp.allclose(out_bf16.astype(jnp.float32), ref_bf16,
                        atol=3e-2, rtol=3e-2), "bf16 mismatch"

    print("KERNEL_OK")
</pallas_src>

<mosaic_0001>
module attributes {stable_mosaic.version = 11 : i64} {
  func.func @_spatial_attention_kernel(%arg0: i32, %arg1: memref<2x32x128xf32, #tpu.memory_space<vmem>>, %arg2: memref<32x4xf32, #tpu.memory_space<vmem>>, %arg3: memref<1x4xf32, #tpu.memory_space<vmem>>, %arg4: memref<4x32xf32, #tpu.memory_space<vmem>>, %arg5: memref<1x32xf32, #tpu.memory_space<vmem>>, %arg6: memref<32x3xf32, #tpu.memory_space<vmem>>, %arg7: memref<1x32xf32, #tpu.memory_space<vmem>>, %arg8: memref<2x128xf32, #tpu.memory_space<vmem>>, %arg9: memref<2x32x128xf32, #tpu.memory_space<vmem>>) attributes {dimension_semantics = [#tpu.dimension_semantics<parallel>], iteration_bounds = array<i64: 1>, scalar_prefetch = 0 : i64, scratch_operands = 0 : i64, tpu.core_type = #tpu.core_type<tc>, window_params = [{transform_indices = @transform_0, window_bounds = array<i64: 2, 32, 128>}, {pipeline_mode = #tpu.pipeline_mode<synchronous>, transform_indices = @transform_1, window_bounds = array<i64: 32, 4>}, {pipeline_mode = #tpu.pipeline_mode<synchronous>, transform_indices = @transform_2, window_bounds = array<i64: 1, 4>}, {pipeline_mode = #tpu.pipeline_mode<synchronous>, transform_indices = @transform_3, window_bounds = array<i64: 4, 32>}, {pipeline_mode = #tpu.pipeline_mode<synchronous>, transform_indices = @transform_4, window_bounds = array<i64: 1, 32>}, {pipeline_mode = #tpu.pipeline_mode<synchronous>, transform_indices = @transform_5, window_bounds = array<i64: 32, 3>}, {pipeline_mode = #tpu.pipeline_mode<synchronous>, transform_indices = @transform_6, window_bounds = array<i64: 1, 32>}, {pipeline_mode = #tpu.pipeline_mode<synchronous>, transform_indices = @transform_7, window_bounds = array<i64: 2, 128>}, {transform_indices = @transform_8, window_bounds = array<i64: 2, 32, 128>}]} {
    %c0 = arith.constant 0 : index
    %c0_0 = arith.constant 0 : index
    %c0_1 = arith.constant 0 : index
    %0 = vector.load %arg1[%c0, %c0_0, %c0_1] : memref<2x32x128xf32, #tpu.memory_space<vmem>>, vector<2x32x128xf32>
    %cst = arith.constant dense<0.000000e+00> : vector<2x32xf32>
    %1 = vector.multi_reduction <add>, %0, %cst [2] : vector<2x32x128xf32> to vector<2x32xf32>
    %cst_2 = arith.constant 7.812500e-03 : f32
    %2 = vector.broadcast %cst_2 : f32 to vector<2x32xf32>
    %3 = arith.mulf %1, %2 : vector<2x32xf32>
    %c0_3 = arith.constant 0 : index
    %c0_4 = arith.constant 0 : index
    %4 = vector.load %arg2[%c0_3, %c0_4] : memref<32x4xf32, #tpu.memory_space<vmem>>, vector<32x4xf32>
    %cst_5 = arith.constant dense<0.000000e+00> : vector<2x4xf32>
    %5 = tpu.matmul %3, %4, %cst_5 {dimension_numbers = #tpu.dot_dimension_numbers<[1], [0], [0], [1], [0, 0, 1, 1], [], []>} : vector<2x32xf32>, vector<32x4xf32>, vector<2x4xf32> -> vector<2x4xf32>
    %c0_6 = arith.constant 0 : index
    %c0_7 = arith.constant 0 : index
    %6 = vector.load %arg3[%c0_6, %c0_7] : memref<1x4xf32, #tpu.memory_space<vmem>>, vector<1x4xf32>
    %7 = vector.broadcast %6 : vector<1x4xf32> to vector<2x4xf32>
    %8 = arith.addf %5, %7 : vector<2x4xf32>
    %cst_8 = arith.constant 0.000000e+00 : f32
    %9 = vector.broadcast %cst_8 : f32 to vector<2x4xf32>
    %10 = arith.maximumf %8, %9 : vector<2x4xf32>
    %c0_9 = arith.constant 0 : index
    %c0_10 = arith.constant 0 : index
    %11 = vector.load %arg4[%c0_9, %c0_10] : memref<4x32xf32, #tpu.memory_space<vmem>>, vector<4x32xf32>
    %cst_11 = arith.constant dense<0.000000e+00> : vector<2x32xf32>
    %12 = tpu.matmul %10, %11, %cst_11 {dimension_numbers = #tpu.dot_dimension_numbers<[1], [0], [0], [1], [0, 0, 1, 1], [], []>} : vector<2x4xf32>, vector<4x32xf32>, vector<2x32xf32> -> vector<2x32xf32>
    %c0_12 = arith.constant 0 : index
    %c0_13 = arith.constant 0 : index
    %13 = vector.load %arg5[%c0_12, %c0_13] : memref<1x32xf32, #tpu.memory_space<vmem>>, vector<1x32xf32>
    %14 = vector.broadcast %13 : vector<1x32xf32> to vector<2x32xf32>
    %15 = arith.addf %12, %14 : vector<2x32xf32>
    %c0_14 = arith.constant 0 : index
    %c0_15 = arith.constant 0 : index
    %16 = vector.load %arg7[%c0_14, %c0_15] : memref<1x32xf32, #tpu.memory_space<vmem>>, vector<1x32xf32>
    %17 = vector.broadcast %16 : vector<1x32xf32> to vector<2x32xf32>
    %18 = arith.addf %15, %17 : vector<2x32xf32>
    %c0_16 = arith.constant 0 : index
    %c0_17 = arith.constant 0 : index
    %19 = vector.load %arg6[%c0_16, %c0_17] : memref<32x3xf32, #tpu.memory_space<vmem>>, vector<32x3xf32>
    %20 = vector.shape_cast %0 : vector<2x32x128xf32> to vector<64x128xf32>
    %21 = vector.extract_strided_slice %19 {offsets = [0, 1], sizes = [32, 1], strides = [1, 1]} : vector<32x3xf32> to vector<32x1xf32>
    %22 = vector.shape_cast %21 : vector<32x1xf32> to vector<1x32x1xf32>
    %23 = vector.broadcast %22 : vector<1x32x1xf32> to vector<2x32x128xf32>
    %24 = arith.mulf %23, %0 : vector<2x32x128xf32>
    %c1_i32 = arith.constant 1 : i32
    %25 = tpu.dynamic_rotate %20 by %c1_i32 dim 1 : vector<64x128xf32>, i32 -> vector<64x128xf32>
    %c0_18 = arith.constant 0 : index
    %c0_19 = arith.constant 0 : index
    %26 = vector.load %arg8[%c0_18, %c0_19] : memref<2x128xf32, #tpu.memory_space<vmem>>, vector<1x128xf32>
    %27 = vector.broadcast %26 : vector<1x128xf32> to vector<64x128xf32>
    %28 = arith.mulf %25, %27 : vector<64x128xf32>
    %29 = vector.extract_strided_slice %19 {offsets = [0, 0], sizes = [32, 1], strides = [1, 1]} : vector<32x3xf32> to vector<32x1xf32>
    %30 = vector.shape_cast %29 : vector<32x1xf32> to vector<1x32x1xf32>
    %31 = vector.shape_cast %28 : vector<64x128xf32> to vector<2x32x128xf32>
    %32 = vector.broadcast %30 : vector<1x32x1xf32> to vector<2x32x128xf32>
    %33 = arith.mulf %32, %31 : vector<2x32x128xf32>
    %34 = arith.addf %24, %33 : vector<2x32x128xf32>
    %c127_i32 = arith.constant 127 : i32
    %35 = tpu.dynamic_rotate %20 by %c127_i32 dim 1 : vector<64x128xf32>, i32 -> vector<64x128xf32>
    %c1 = arith.constant 1 : index
    %c0_20 = arith.constant 0 : index
    %36 = vector.load %arg8[%c1, %c0_20] : memref<2x128xf32, #tpu.memory_space<vmem>>, vector<1x128xf32>
    %37 = vector.broadcast %36 : vector<1x128xf32> to vector<64x128xf32>
    %38 = arith.mulf %35, %37 : vector<64x128xf32>
    %39 = vector.extract_strided_slice %19 {offsets = [0, 2], sizes = [32, 1], strides = [1, 1]} : vector<32x3xf32> to vector<32x1xf32>
    %40 = vector.shape_cast %39 : vector<32x1xf32> to vector<1x32x1xf32>
    %41 = vector.shape_cast %38 : vector<64x128xf32> to vector<2x32x128xf32>
    %42 = vector.broadcast %40 : vector<1x32x1xf32> to vector<2x32x128xf32>
    %43 = arith.mulf %42, %41 : vector<2x32x128xf32>
    %44 = arith.addf %34, %43 : vector<2x32x128xf32>
    %45 = vector.shape_cast %18 : vector<2x32xf32> to vector<2x32x1xf32>
    %46 = vector.broadcast %45 : vector<2x32x1xf32> to vector<2x32x128xf32>
    %47 = arith.addf %46, %44 : vector<2x32x128xf32>
    %cst_21 = arith.constant 5.000000e-01 : f32
    %48 = vector.broadcast %cst_21 : f32 to vector<2x32x128xf32>
    %49 = arith.mulf %48, %47 : vector<2x32x128xf32>
    %50 = math.tanh %49 : vector<2x32x128xf32>
    %cst_22 = arith.constant 1.000000e+00 : f32
    %51 = vector.broadcast %cst_22 : f32 to vector<2x32x128xf32>
    %52 = arith.addf %50, %51 : vector<2x32x128xf32>
    %cst_23 = arith.constant 5.000000e-01 : f32
    %53 = vector.broadcast %cst_23 : f32 to vector<2x32x128xf32>
    %54 = arith.mulf %53, %52 : vector<2x32x128xf32>
    %55 = arith.mulf %0, %54 : vector<2x32x128xf32>
    %c0_24 = arith.constant 0 : index
    %c0_25 = arith.constant 0 : index
    %c0_26 = arith.constant 0 : index
    %56 = vector.load %arg9[%c0_24, %c0_25, %c0_26] : memref<2x32x128xf32, #tpu.memory_space<vmem>>, vector<2x32x128xf32>
    tpu.vector_store %arg9[%c0_24, %c0_25, %c0_26], %55 {strides = array<i32>} : memref<2x32x128xf32, #tpu.memory_space<vmem>>, vector<2x32x128xf32>,
    return
  }
  func.func @transform_0(%arg0: i32) -> (i32, i32, i32) {
    %c0_i32 = arith.constant 0 : i32
    %c0_i32_0 = arith.constant 0 : i32
    %c0_i32_1 = arith.constant 0 : i32
    return %arg0, %c0_i32, %c0_i32_0 : i32, i32, i32
  }
  func.func @transform_1(%arg0: i32) -> (i32, i32) {
    %c0_i32 = arith.constant 0 : i32
    %c0_i32_0 = arith.constant 0 : i32
    %c0_i32_1 = arith.constant 0 : i32
    return %c0_i32, %c0_i32_0 : i32, i32
  }
  func.func @transform_2(%arg0: i32) -> (i32, i32) {
    %c0_i32 = arith.constant 0 : i32
    %c0_i32_0 = arith.constant 0 : i32
    %c0_i32_1 = arith.constant 0 : i32
    return %c0_i32, %c0_i32_0 : i32, i32
  }
  func.func @transform_3(%arg0: i32) -> (i32, i32) {
    %c0_i32 = arith.constant 0 : i32
    %c0_i32_0 = arith.constant 0 : i32
    %c0_i32_1 = arith.constant 0 : i32
    return %c0_i32, %c0_i32_0 : i32, i32
  }
  func.func @transform_4(%arg0: i32) -> (i32, i32) {
    %c0_i32 = arith.constant 0 : i32
    %c0_i32_0 = arith.constant 0 : i32
    %c0_i32_1 = arith.constant 0 : i32
    return %c0_i32, %c0_i32_0 : i32, i32
  }
  func.func @transform_5(%arg0: i32) -> (i32, i32) {
    %c0_i32 = arith.constant 0 : i32
    %c0_i32_0 = arith.constant 0 : i32
    %c0_i32_1 = arith.constant 0 : i32
    return %c0_i32, %c0_i32_0 : i32, i32
  }
  func.func @transform_6(%arg0: i32) -> (i32, i32) {
    %c0_i32 = arith.constant 0 : i32
    %c0_i32_0 = arith.constant 0 : i32
    %c0_i32_1 = arith.constant 0 : i32
    return %c0_i32, %c0_i32_0 : i32, i32
  }
  func.func @transform_7(%arg0: i32) -> (i32, i32) {
    %c0_i32 = arith.constant 0 : i32
    %c0_i32_0 = arith.constant 0 : i32
    %c0_i32_1 = arith.constant 0 : i32
    return %c0_i32, %c0_i32_0 : i32, i32
  }
  func.func @transform_8(%arg0: i32) -> (i32, i32, i32) {
    %c0_i32 = arith.constant 0 : i32
    %c0_i32_0 = arith.constant 0 : i32
    %c0_i32_1 = arith.constant 0 : i32
    return %arg0, %c0_i32, %c0_i32_0 : i32, i32, i32
  }
}

</mosaic_0001>

<bundles_post_ra>
// kernel: tpu_custom_call.1
= control target key start
LH: loop header
LB: loop body
LE: loop exit
PB: predicated region body
PF: predicated region fallthrough
CT: control target
= control target key end

     0   :  { %s859_s0 = inlined_call_operand.vmem [shape: f32[2,32,128], index: 0, kind: input, shape index: {}]   ;;  %s860_s1 = inlined_call_operand.vmem [shape: f32[32,4], index: 1, kind: input, shape index: {}]   ;;  %s861_s2 = inlined_call_operand.vmem [shape: f32[1,4], index: 2, kind: input, shape index: {}]   ;;  %s862_s3 = inlined_call_operand.vmem [shape: f32[4,32], index: 3, kind: input, shape index: {}]   ;;  %s863_s4 = inlined_call_operand.vmem [shape: f32[1,32], index: 4, kind: input, shape index: {}]   ;;  %s864_s5 = inlined_call_operand.vmem [shape: f32[32,3], index: 5, kind: input, shape index: {}]   ;;  %s865_s6 = inlined_call_operand.vmem [shape: f32[1,32], index: 6, kind: input, shape index: {}]   ;;  %s866_s7 = inlined_call_operand.vmem [shape: f32[2,128], index: 7, kind: input, shape index: {}]   ;;  %s867_s8 = inlined_call_operand.hbm [shape: f32[2,32,128], index: 8, kind: output, shape index: {}]  }
   0x1   :  { %v703_v0 = vld [vmem:[%s859_s0 + $0x20] sm:$0xff]  ;;  %v715_v2 = vld [vmem:[%s859_s0 + $0x28] sm:$0xff] }
   0x2   :  { %v708_v1 = vld [vmem:[%s859_s0] sm:$0xff]  ;;  %46 = vadd.xlane.f32.xlu1 %v703_v0  ;;  %v720_v3 = vld [vmem:[%s859_s0 + $0x8] sm:$0xff] }
   0x3   :  { %38 = vadd.xlane.f32.xlu0 %v708_v1 }
   0x4   :  { %13 = vsyncpa [#allocation3], 0  ;;  %v727_v4 = vld [vmem:[%s859_s0 + $0x30] sm:$0xff]  ;;  %v739_v6 = vld [vmem:[%s859_s0 + $0x38] sm:$0xff]  ;;  %v645_v8 = vmov 0.0   ;;  %vm646_vm0 = vmmov 0   ;;  %v81_v13 = vlaneseq }
   0x5   :  { %v732_v5 = vld [vmem:[%s859_s0 + $0x10] sm:$0xff]  ;;  %v744_v7 = vld [vmem:[%s859_s0 + $0x18] sm:$0xff]  ;;  %576 = vmatprep.subr.mxu0 %v645_v8  ;;  %587 = vmatprep.subr.mxu1 %v645_v8  ;;  %v63_v11 = vld [vmem:[%s860_s1 + $0x8] sm:$0xff]  ;;  %vm92_vm1 = vcmask 130112   ;;  %vm99_vm2 = vcmask 195712   ;;  %vm106_vm3 = vcmask 261312  }
   0x6   :  { %48 = vadd.xlane.f32.xlu1 %v715_v2  ;;  %v65_v9 = vld [vmem:[%s860_s1 + $0x18] sm:$0xff]  ;;  %v64_v10 = vld [vmem:[%s860_s1 + $0x10] sm:$0xff]  ;;  %v62_v12 = vld [vmem:[%s860_s1] sm:$0xff]  ;;  %584 = vmatprep.mubr.msk.f32.mxu0 %vm646_vm0, %v645_v8  ;;  %v82_v16 = vand.u32 127, %v81_v13  ;;  %v760_v18 = vshrl.u32 %v81_v13, 7  ;;  %vm127_vm4 = vcmask 1041409  }
   0x7   :  { %40 = vadd.xlane.f32.xlu0 %v720_v3  ;;  %577 = vmatpush3.msra.mxu0 %v65_v9  ;;  %vm129_vm5 = vcmask 261120   ;;  %v203_v54 = vld [vmem:[%s862_s3] sm:$0xf]  ;;  %vm215_vm6 = vcmask 1043456   ;;  %v298_v55 = vld [vmem:[%s864_s5 + $0x8] sm:$0xff]  ;;  %v647_v56 = vmov 1  }
   0x8   :  { %578 = vmatprep.subr.mxu0 %v645_v8  ;;  %589 = vmatprep.mubr.msk.f32.mxu1 %vm646_vm0, %v645_v8  ;;  %v87_v17 = vadd.s32 4294967288, %v82_v16  ;;  %v94_v21 = vadd.s32 4294967280, %v82_v16  ;;  %v101_v25 = vadd.s32 4294967272, %v82_v16  ;;  %v85_v26 = vsub.s32 %v82_v16, %v760_v18  ;;  %v297_v57 = vld [vmem:[%s864_s5] sm:$0xff]  ;;  %v299_v58 = vld [vmem:[%s864_s5 + $0x10] sm:$0xff]  ;;  %v300_v60 = vld [vmem:[%s864_s5 + $0x18] sm:$0xff] }
   0x9   :  { %579 = vmatpush3.msra.mxu0 %v64_v10  ;;  %588 = vmatpush3.msk.msra.mxu1 %vm215_vm6, %v203_v54  ;;  %v648_v59 = vmov 2   ;;  %s649_s14 = smov 1   ;;  %v650_v61 = vmov 0   ;;  %s651_s15 = smov 127   ;;  %v561_v62 = vld [vmem:[%s861_s2] ss:$0 sm:$0xff] }
   0xa   :  { %50 = vadd.xlane.f32.xlu1 %v727_v4  ;;  %580 = vmatprep.subr.mxu0 %v645_v8  ;;  %v90_v22 = vsub.s32 %v87_v17, %v760_v18  ;;  %v97_v27 = vsub.s32 %v94_v21, %v760_v18  ;;  %v104_v36 = vsub.s32 %v101_v25, %v760_v18  ;;  %vm211_vm7 = vcmask 31744   ;;  %v566_v13 = vld [vmem:[%s865_s6] ss:$0 sm:$0xff] }
   0xb   :  { %42 = vadd.xlane.f32.xlu0 %v732_v5  ;;  %581 = vmatpush3.msra.mxu0 %v63_v11  ;;  %v563_v11 = vld [vmem:[%s863_s4] ss:$0 sm:$0xff] }
   0xc   :  { %582 = vmatprep.subr.mxu0 %v645_v8  ;;  %603 = vset.pattern.permute.xlu1 %v647_v56 }
   0xd   :  { %583 = vmatpush3.msra.mxu0 %v62_v12  ;;  %602 = vset.pattern.permute.xlu0 %v647_v56 }
   0xe   :  { %52 = vadd.xlane.f32.xlu1 %v739_v6 }
   0xf   :  { %44 = vadd.xlane.f32.xlu0 %v744_v7 }
  0x1f   :  { %308 = vperm.xlu1 %603, %v298_v55  }
  0x23   :  { %313 = vperm.xlu1 %603, %v299_v58  }
  0x25   :  { %303 = vperm.xlu0 %602, %v297_v57  }
  0x27   :  { %318 = vperm.xlu1 %603, %v300_v60  }
  0x29   :  { %606 = vset.pattern.permute.xlu0 %v648_v59 }
  0x2a   :  { %424 = vperm.xlu0 %606, %v298_v55  }
  0x2b   :  { %604 = vset.pattern.permute.xlu1 %v650_v61 }
  0x2c   :  { %359 = vperm.xlu1 %604, %v297_v57  }
  0x2e   :  { %329 = vrot.lane.b32.xlu0 %v708_v1, %s649_s14 }
  0x30   :  { %363 = vperm.xlu1 %604, %v298_v55  }
  0x32   :  { %333 = vrot.lane.b32.xlu0 %v732_v5, %s649_s14 }
  0x34   :  { %367 = vperm.xlu1 %604, %v299_v58  }
  0x36   :  { %337 = vrot.lane.b32.xlu0 %v703_v0, %s649_s14 }
  0x38   :  { %371 = vperm.xlu1 %604, %v300_v60  }
  0x3a   :  { %341 = vrot.lane.b32.xlu0 %v727_v4, %s649_s14 }
  0x3c   :  { %605 = vset.pattern.permute.xlu1 %v648_v59 }
  0x3d   :  { %420 = vperm.xlu1 %605, %v297_v57  }
  0x3e   :  { %390 = vrot.lane.b32.xlu0 %v708_v1, %s651_s15 }
  0x41   :  { %428 = vperm.xlu1 %605, %v299_v58  }
  0x42   :  { %394 = vrot.lane.b32.xlu0 %v732_v5, %s651_s15 }
  0x45   :  { %432 = vperm.xlu1 %605, %v300_v60  }
  0x46   :  { %398 = vrot.lane.b32.xlu0 %v703_v0, %s651_s15 }
  0x49   :  { %331 = vrot.lane.b32.xlu1 %v720_v3, %s649_s14 }
  0x4a   :  { %402 = vrot.lane.b32.xlu0 %v727_v4, %s651_s15 }
  0x4d   :  { %335 = vrot.lane.b32.xlu1 %v744_v7, %s649_s14 }
  0x51   :  { %339 = vrot.lane.b32.xlu1 %v715_v2, %s649_s14 }
  0x55   :  { %343 = vrot.lane.b32.xlu1 %v739_v6, %s649_s14 }
  0x59   :  { %392 = vrot.lane.b32.xlu1 %v720_v3, %s651_s15 }
  0x5d   :  { %396 = vrot.lane.b32.xlu1 %v744_v7, %s651_s15 }
  0x61   :  { %400 = vrot.lane.b32.xlu1 %v715_v2, %s651_s15 }
  0x65   :  { %404 = vrot.lane.b32.xlu1 %v739_v6, %s651_s15 }
  0x8b   :  { %v47_v14 = vpop.xlane.xlu1 %46 }
  0x8c   :  { %v39_v15 = vpop.xlane.xlu0 %38  ;;  %v58_v30 = vmul.f32 0.0078125, %v47_v14 }
  0x8d   :  { %v54_v31 = vmul.f32 0.0078125, %v39_v15  ;;  %v453_v15 = vsub.s32 0, %v760_v18 }
  0x8e   :  { %v111_v41 = vrot.slane %v58_v30, %v85_v26 }
  0x8f   :  { %v49_v19 = vpop.xlane.xlu1 %48  ;;  %v86_v42 = vrot.slane %v54_v31, %v85_v26 }
  0x90   :  { %v41_v20 = vpop.xlane.xlu0 %40  ;;  %v59_v23 = vmul.f32 0.0078125, %v49_v19 }
  0x91   :  { %v55_v24 = vmul.f32 0.0078125, %v41_v20  ;;  %v472_v20 = vsub.s32 1, %v760_v18 }
  0x92   :  { %v115_v34 = vrot.slane %v59_v23, %v90_v22 }
  0x93   :  { %v51_v28 = vpop.xlane.xlu1 %50  ;;  %v91_v35 = vrot.slane %v55_v24, %v90_v22 }
  0x94   :  { %v43_v29 = vpop.xlane.xlu0 %42  ;;  %v60_v32 = vmul.f32 0.0078125, %v51_v28  ;;  %v116_v45 = vsel %vm92_vm1, %v115_v34, %v111_v41 }
  0x95   :  { %v56_v33 = vmul.f32 0.0078125, %v43_v29  ;;  %v93_v46 = vsel %vm92_vm1, %v91_v35, %v86_v42 }
  0x96   :  { %v120_v37 = vrot.slane %v60_v32, %v97_v27 }
  0x97   :  { %v98_v38 = vrot.slane %v56_v33, %v97_v27  ;;  %v53_v39 = vpop.xlane.xlu1 %52 }
  0x98   :  { %v45_v40 = vpop.xlane.xlu0 %44  ;;  %v61_v43 = vmul.f32 0.0078125, %v53_v39  ;;  %v121_v49 = vsel %vm99_vm2, %v120_v37, %v116_v45 }
  0x99   :  { %v57_v44 = vmul.f32 0.0078125, %v45_v40  ;;  %v100_v50 = vsel %vm99_vm2, %v98_v38, %v93_v46 }
  0x9a   :  { %v125_v47 = vrot.slane %v61_v43, %v104_v36  ;;  %v567_v43 = vld [vmem:[%s866_s7] ss:$0 sm:$0xff] }
  0x9b   :  { %v105_v48 = vrot.slane %v57_v44, %v104_v36  ;;  %v309_v22 = vpop.permute.xlu1 %308 }
  0x9c   :  { %v126_v52 = vsel %vm106_vm3, %v125_v47, %v121_v49  ;;  %v322_v49 = vmul.f32 %v309_v22, %v720_v3 }
  0x9d   :  { %v107_v51 = vsel %vm106_vm3, %v105_v48, %v100_v50  ;;  %v568_v48 = vld [vmem:[%s866_s7 + $0x1] ss:$0 sm:$0xff]  ;;  %s652_s7 = smov [#allocation2]  }
  0x9e   :  { %v128_v53 = vsel %vm127_vm4, %v126_v52, %v107_v51  ;;  %s550_s22 = sshll.u32 %s652_s7, 4  ;;  %s551_s22 = int_to_ptr.vmem [resolvable:$true] %s550_s22 }
  0x9f   :  { %585 = vmatmul.mubr.msk.f32.vlgmr.msra.gmra.mxu0 %vm129_vm5, %v128_v53  ;;  %v810_v23 = vpop.permute.xlu1 %313  ;;  %s623_s23 = scalar_lea.vmem %s551_s22, 1024  ;;  %p628_p1 = scmp.lt.s32.totalorder %s551_s22, %s551_s22 }
  0xa0   :  { %v304_v30 = vpop.permute.xlu0 %303  ;;  %v323_v59 = vmul.f32 %v810_v23, %v732_v5  ;;  %p624_p0 = scmp.ne.s32.totalorder %s551_s22, %s623_s23  ;;  %p629_p2 = scmp.lt.s32.totalorder %s623_s23, %s623_s23 }
  0xa1   :  { %v321_v55 = vmul.f32 %v304_v30, %v708_v1 }
  0xa2   :  { %p630_p3 = por %p629_p2, %p628_p1 }
  0xa3   :  { %v812_v24 = vpop.permute.xlu1 %318 }
  0xa4   :  { %v324_v60 = vmul.f32 %v812_v24, %v744_v7  ;;  %p631_p4 = pnand %p630_p3, %p624_p0 }
  0xa5   :  { %v425_v32 = vpop.permute.xlu0 %424 }
  0xa7   :  { %v360_v25 = vpop.permute.xlu1 %359 }
  0xa9   :  { %v330_v34 = vpop.permute.xlu0 %329 }
  0xaa   :  { %v350_v47 = vmul.f32 %v567_v43, %v330_v34 }
  0xab   :  { %v364_v26 = vpop.permute.xlu1 %363 }
  0xac   :  { %v374_v56 = vmul.f32 %v360_v25, %v350_v47 }
  0xad   :  { %v334_v36 = vpop.permute.xlu0 %333 }
  0xae   :  { %v352_v52 = vmul.f32 %v567_v43, %v334_v36 }
  0xaf   :  { %v814_v27 = vpop.permute.xlu1 %367 }
  0xb1   :  { %v338_v38 = vpop.permute.xlu0 %337 }
  0xb3   :  { %v372_v28 = vpop.permute.xlu1 %371 }
  0xb5   :  { %v342_v40 = vpop.permute.xlu0 %341 }
  0xb8   :  { %v816_v29 = vpop.permute.xlu1 %420 }
  0xb9   :  { %v391_v42 = vpop.permute.xlu0 %390 }
  0xba   :  { %v411_v58 = vmul.f32 %v568_v48, %v391_v42 }
  0xbc   :  { %v818_v18 = vpop.permute.xlu1 %428 }
  0xbd   :  { %v395_v45 = vpop.permute.xlu0 %394 }
  0xc0   :  { %v820_v31 = vpop.permute.xlu1 %432 }
  0xc1   :  { %v399_v54 = vpop.permute.xlu0 %398 }
  0xc4   :  { %v332_v33 = vpop.permute.xlu1 %331 }
  0xc5   :  { %v351_v46 = vmul.f32 %v567_v43, %v332_v33 }
  0xc7   :  { %v375_v50 = vmul.f32 %v364_v26, %v351_v46 }
  0xc8   :  { %v336_v35 = vpop.permute.xlu1 %335 }
  0xc9   :  { %v353_v51 = vmul.f32 %v567_v43, %v336_v35 }
  0xcc   :  { %v340_v37 = vpop.permute.xlu1 %339 }
  0xcd   :  { %v355_v61 = vmul.f32 %v567_v43, %v340_v37  ;;  %v415_v37 = vmul.f32 %v568_v48, %v399_v54 }
  0xcf   :  { %v379_v33 = vmul.f32 %v364_v26, %v355_v61 }
  0xd0   :  { %v344_v39 = vpop.permute.xlu1 %343 }
  0xd4   :  { %v393_v41 = vpop.permute.xlu1 %392 }
  0xd5   :  { %v412_v57 = vmul.f32 %v568_v48, %v393_v41 }
  0xd8   :  { %v397_v44 = vpop.permute.xlu1 %396 }
  0xdc   :  { %v401_v53 = vpop.permute.xlu1 %400 }
  0xdd   :  { %v416_v34 = vmul.f32 %v568_v48, %v401_v53 }
 0x15f   :  { %v198_v63 = vpop.f32.mrf.mxu0 }
 0x160   :  { %v199_v8 = vadd.f32 %v561_v62, %v198_v63  ;;  %v383_v62 = vadd.f32 %v375_v50, %v322_v49  ;;  %v377_v63 = vmul.f32 %v372_v28, %v353_v51  ;;  %v439_v50 = vmul.f32 %v816_v29, %v415_v37 }
 0x161   :  { %v586_v9 = vpop.f32.mrf.mxu0 }
 0x162   :  { %v202_v10 = vmax.f32 %v199_v8, 0.0  ;;  %v376_v8 = vmul.f32 %v814_v27, %v352_v52  ;;  %v354_v9 = vmul.f32 %v567_v43, %v338_v38  ;;  %v385_v38 = vadd.f32 %v377_v63, %v324_v60 }
 0x164   :  { %590 = vmatmul.mubr.msk.f32.vlgmr.msra.gmra.mxu1 %vm211_vm7, %v202_v10  ;;  %v414_v10 = vmul.f32 %v568_v48, %v397_v44  ;;  %v378_v35 = vmul.f32 %v360_v25, %v354_v9 }
 0x166   :  { %v438_v36 = vmul.f32 %v820_v31, %v414_v10 }
 0x168   :  { %v446_v52 = vadd.f32 %v438_v36, %v385_v38 }
 0x224   :  { %v285_v12 = vpop.f32.mrf.mxu1 }
 0x225   :  { %v286_v14 = vadd.f32 %v563_v11, %v285_v12  ;;  %v436_v11 = vmul.f32 %v425_v32, %v412_v57  ;;  %v435_v12 = vmul.f32 %v816_v29, %v411_v58 }
 0x226   :  { %v591_v16 = vpop.f32.mrf.mxu1 }
 0x227   :  { %v296_v17 = vadd.f32 %v566_v13, %v286_v14  ;;  %v413_v13 = vmul.f32 %v568_v48, %v395_v45  ;;  %v382_v14 = vadd.f32 %v374_v56, %v321_v55  ;;  %v356_v16 = vmul.f32 %v567_v43, %v342_v40 }
 0x228   :  { %v444_v42 = vadd.f32 %v436_v11, %v383_v62  ;;  %v384_v45 = vadd.f32 %v376_v8, %v323_v59 }
 0x229   :  { %v454_v19 = vrot.slane %v296_v17, %v453_v15  ;;  %v473_v21 = vrot.slane %v296_v17, %v472_v20  ;;  %v357_v15 = vmul.f32 %v567_v43, %v344_v39  ;;  %v405_v17 = vpop.permute.xlu1 %404  ;;  %v326_v20 = vmul.f32 %v309_v22, %v715_v2 }
 0x22a   :  { %v437_v41 = vmul.f32 %v818_v18, %v413_v13  ;;  %v443_v44 = vadd.f32 %v435_v12, %v382_v14  ;;  %v327_v39 = vmul.f32 %v810_v23, %v727_v4  ;;  %v328_v22 = vmul.f32 %v812_v24, %v739_v6 }
 0x22b   :  { %460 = vbcast.lane.b32.xlu1 %v454_v19, 264  ;;  %456 = vbcast.lane.b32.xlu0 %v454_v19, 256  ;;  %v381_v40 = vmul.f32 %v372_v28, %v357_v15  ;;  %v380_v26 = vmul.f32 %v814_v27, %v356_v16  ;;  %v440_v43 = vmul.f32 %v425_v32, %v416_v34 }
 0x22c   :  { %v418_v46 = vmul.f32 %v568_v48, %v405_v17  ;;  %v387_v53 = vadd.f32 %v379_v33, %v326_v20  ;;  %v445_v23 = vadd.f32 %v437_v41, %v384_v45 }
 0x22d   :  { %v389_v59 = vadd.f32 %v381_v40, %v328_v22  ;;  %v388_v60 = vadd.f32 %v380_v26, %v327_v39 }
 0x22e   :  { %v442_v28 = vmul.f32 %v820_v31, %v418_v46  ;;  %v448_v61 = vadd.f32 %v440_v43, %v387_v53 }
 0x22f   :  { %468 = vbcast.lane.b32.xlu1 %v454_v19, 280  ;;  %464 = vbcast.lane.b32.xlu0 %v454_v19, 272  ;;  %v403_v19 = vpop.permute.xlu0 %402 }
 0x230   :  { %v417_v51 = vmul.f32 %v568_v48, %v403_v19  ;;  %v450_v12 = vadd.f32 %v442_v28, %v389_v59 }
 0x232   :  { %v441_v32 = vmul.f32 %v818_v18, %v417_v51 }
 0x233   :  { %479 = vbcast.lane.b32.xlu1 %v473_v21, 264  ;;  %475 = vbcast.lane.b32.xlu0 %v473_v21, 256 }
 0x234   :  { %v449_v13 = vadd.f32 %v441_v32, %v388_v60 }
 0x237   :  { %487 = vbcast.lane.b32.xlu1 %v473_v21, 280  ;;  %483 = vbcast.lane.b32.xlu0 %v473_v21, 272  ;;  %v325_v21 = vmul.f32 %v304_v30, %v703_v0 }
 0x239   :  { %v386_v56 = vadd.f32 %v378_v35, %v325_v21 }
 0x23b   :  { %v447_v62 = vadd.f32 %v439_v50, %v386_v56 }
 0x29d   :  { %v461_v30 = vpop.permute.xlu1 %460  ;;  %v457_v25 = vpop.permute.xlu0 %456 }
 0x29e   :  { %v490_v47 = vadd.f32 %v461_v30, %v444_v42  ;;  %v489_v49 = vadd.f32 %v457_v25, %v443_v44 }
 0x2a0   :  { %v498_v54 = vmul.f32 0.5, %v490_v47  ;;  %v497_v55 = vmul.f32 0.5, %v489_v49 }
 0x2a1   :  { %v469_v57 = vpop.permute.xlu1 %468  ;;  %v465_v24 = vpop.permute.xlu0 %464 }
 0x2a2   :  { %607 = vtanh.f32 %v498_v54  ;;  %v492_v27 = vadd.f32 %v469_v57, %v446_v52  ;;  %v491_v58 = vadd.f32 %v465_v24, %v445_v23 }
 0x2a3   :  { %609 = vtanh.f32 %v497_v55 }
 0x2a4   :  { %v500_v29 = vmul.f32 0.5, %v492_v27  ;;  %v499_v48 = vmul.f32 0.5, %v491_v58 }
 0x2a5   :  { %v480_v63 = vpop.permute.xlu1 %479  ;;  %v476_v8 = vpop.permute.xlu0 %475 }
 0x2a6   :  { %611 = vtanh.f32 %v500_v29  ;;  %v494_v9 = vadd.f32 %v480_v63, %v448_v61  ;;  %v493_v10 = vadd.f32 %v476_v8, %v447_v62 }
 0x2a7   :  { %613 = vtanh.f32 %v499_v48 }
 0x2a8   :  { %v502_v11 = vmul.f32 0.5, %v494_v9  ;;  %v501_v31 = vmul.f32 0.5, %v493_v10 }
 0x2a9   :  { %v488_v14 = vpop.permute.xlu1 %487  ;;  %v484_v15 = vpop.permute.xlu0 %483 }
 0x2aa   :  { %615 = vtanh.f32 %v502_v11  ;;  %v496_v18 = vadd.f32 %v488_v14, %v450_v12  ;;  %v495_v16 = vadd.f32 %v484_v15, %v449_v13 }
 0x2ab   :  { %617 = vtanh.f32 %v501_v31 }
 0x2ac   :  { %v504_v17 = vmul.f32 0.5, %v496_v18  ;;  %v503_v19 = vmul.f32 0.5, %v495_v16 }
 0x2ae   :  { %619 = vtanh.f32 %v504_v17 }
 0x2af   :  { %v608_v20 = vpop.eup %607  ;;  %621 = vtanh.f32 %v503_v19 }
 0x2b0   :  { %v610_v21 = vpop.eup %609  ;;  %v514_v33 = vadd.f32 1.0, %v608_v20 }
 0x2b1   :  { %v513_v34 = vadd.f32 1.0, %v610_v21 }
 0x2b2   :  { %v522_v35 = vmul.f32 0.5, %v514_v33 }
 0x2b3   :  { %v612_v36 = vpop.eup %611  ;;  %v521_v37 = vmul.f32 0.5, %v513_v34 }
 0x2b4   :  { %v614_v38 = vpop.eup %613  ;;  %v530_v41 = vmul.f32 %v522_v35, %v720_v3  ;;  %v516_v42 = vadd.f32 1.0, %v612_v36 }
 0x2b5   :  { %v529_v44 = vmul.f32 %v521_v37, %v708_v1  ;;  %v515_v45 = vadd.f32 1.0, %v614_v38 }
 0x2b6   :  { %538 = vst [vmem:[#allocation2 + $0x8] sm:$0xff] %v530_v41  ;;  %v524_v39 = vmul.f32 0.5, %v516_v42 }
 0x2b7   :  { %v616_v22 = vpop.eup %615  ;;  %537 = vst [vmem:[#allocation2] sm:$0xff] %v529_v44  ;;  %v523_v40 = vmul.f32 0.5, %v515_v45 }
 0x2b8   :  { %v618_v26 = vpop.eup %617  ;;  %v532_v30 = vmul.f32 %v524_v39, %v744_v7  ;;  %v518_v25 = vadd.f32 1.0, %v616_v22 }
 0x2b9   :  { %v531_v43 = vmul.f32 %v523_v40, %v732_v5  ;;  %v517_v46 = vadd.f32 1.0, %v618_v26 }
 0x2ba   :  { %540 = vst [vmem:[#allocation2 + $0x18] sm:$0xff] %v532_v30  ;;  %v526_v47 = vmul.f32 0.5, %v518_v25 }
 0x2bb   :  { %v620_v49 = vpop.eup %619  ;;  %539 = vst [vmem:[#allocation2 + $0x10] sm:$0xff] %v531_v43  ;;  %v525_v3 = vmul.f32 0.5, %v517_v46 }
 0x2bc   :  { %v622_v50 = vpop.eup %621  ;;  %v534_v1 = vmul.f32 %v526_v47, %v715_v2  ;;  %v520_v51 = vadd.f32 1.0, %v620_v49 }
 0x2bd   :  { %v533_v52 = vmul.f32 %v525_v3, %v703_v0  ;;  %v519_v53 = vadd.f32 1.0, %v622_v50 }
 0x2be   :  { %542 = vst [vmem:[#allocation2 + $0x28] sm:$0xff] %v534_v1  ;;  %v528_v7 = vmul.f32 0.5, %v520_v51 }
 0x2bf   :  { %541 = vst [vmem:[#allocation2 + $0x20] sm:$0xff] %v533_v52  ;;  %v527_v54 = vmul.f32 0.5, %v519_v53 }
 0x2c0   :  { %v536_v5 = vmul.f32 %v528_v7, %v739_v6 }
 0x2c1   :  { %v535_v55 = vmul.f32 %v527_v54, %v727_v4 }
 0x2c2   :  { %544 = vst [vmem:[#allocation2 + $0x38] sm:$0xff] %v536_v5 }
 0x2c3   :  { %543 = vst [vmem:[#allocation2 + $0x30] sm:$0xff] %v535_v55 }
 0x2c4   :  { %634 = shalt.err (!%p631_p4)
}
 0x2c5   :  { %s653_s24 = smov 128   ;;  %s654_s0 = smov 8  }
 0x2c6   :  { %556 = dma.vmem_to_hbm [thread:$0]  %s551_s22, 1024, %s867_s8, [#allocation3], %s653_s24, %s653_s24, %s654_s0  }
 0x2c7   :  { %643 = dma.done.wait [#allocation3], 1024  }
 0x2c8   :  { %644 = vsyncadd [#allocation3], 4294966272 }
 0x2c9   :  { %560 = vsyncpa [#allocation3], 1 }

</bundles_post_ra>
